<compile_context>
chip_gen: v5e
topology: v5e:2x2
jax: 0.10.0
libtpu: 0.0.40
codegen_flags: <defaults>
</compile_context>

<pallas_src>
import math

import jax
import jax.numpy as jnp
from jax import lax
from jax.experimental import pallas as pl
from jax.experimental.pallas import tpu as pltpu


def _round_up(x: int, m: int) -> int:
    return ((x + m - 1) // m) * m


# --------------------------------------------------------------------------
# Path A: small-table fast path -- all tables VMEM-resident, no DMAs at all.
# Row gather is a one-hot MXU contraction (only selected when N is small, so
# the (TM, N) one-hot tile is tiny).
# --------------------------------------------------------------------------
def _resident_kernel(ids_ref, w_ref, us_ref, v_ref, out_ref):
    # ids_ref : VMEM (1, TM, 1) int32   token ids for this tile
    # w_ref   : VMEM (N, E)             residual embedding table
    # us_ref  : VMEM (N, r)             U * S (S folded once in the wrapper)
    # v_ref   : VMEM (r, E)  f32        adapter projection
    # out_ref : VMEM (TM, E)
    n = w_ref.shape[0]
    tm = out_ref.shape[0]
    ids = ids_ref[0]                                           # (TM, 1) int32
    col_iota = lax.broadcasted_iota(jnp.int32, (tm, n), 1)     # (TM, N)
    onehot = (ids == col_iota).astype(w_ref.dtype)             # (TM, N)
    base_rows = jnp.dot(onehot, w_ref[...],
                        preferred_element_type=jnp.float32)    # (TM, E)
    us_rows = jnp.dot(onehot, us_ref[...],
                      preferred_element_type=jnp.float32)      # (TM, r)
    delta = jnp.dot(us_rows, v_ref[...],
                    preferred_element_type=jnp.float32)        # (TM, E)
    out_ref[...] = (base_rows + delta).astype(out_ref.dtype)


# --------------------------------------------------------------------------
# Path B: large-table gather path -- fused [W_res | U*S] table stays in HBM,
# one row DMA per token, double-buffered across grid steps.
# --------------------------------------------------------------------------
def _gather_kernel(ids_ref, wus_hbm, v_ref, out_ref, buf, sems):
    # ids_ref : SMEM (T_pad,) int32     scalar-prefetched token ids
    # wus_hbm : HBM  (N, E + rpad)      fused [W_res | U*S] rows (not auto-DMA'd)
    # v_ref   : VMEM (r, E)  f32        resident adapter projection
    # out_ref : VMEM (TM, E)
    # buf     : VMEM (2*TM, E + rpad)   double-buffered gathered rows (persists)
    # sems    : DMA semaphores (2,)     one per buffer slot
    tm, e = out_ref.shape
    r = v_ref.shape[0]

    i = pl.program_id(0)
    nsteps = pl.num_programs(0)
    slot = i % 2
    nslot = 1 - slot

    def issue_tile(tile_idx, slot_idx):
        base_tok = tile_idx * tm
        base_row = slot_idx * tm

        def body(t, c):
            tok = ids_ref[base_tok + t]
            pltpu.make_async_copy(wus_hbm.at[tok],
                                  buf.at[base_row + t],
                                  sems.at[slot_idx]).start()
            return c

        lax.fori_loop(0, tm, body, 0, unroll=True)

    # Prime the pipeline on the first grid step.
    @pl.when(i == 0)
    def _():
        issue_tile(0, 0)

    # Prefetch the NEXT tile's rows into the other slot BEFORE waiting on the
    # current slot, so the gather overlaps this tile's compute + writeback.
    @pl.when(i + 1 < nsteps)
    def _():
        issue_tile(i + 1, nslot)

    # Wait for the current slot.  Every copy on this semaphore has identical
    # byte size (one fused row), so TM waits consume exactly what was signaled.
    def wait_body(t, c):
        pltpu.make_async_copy(wus_hbm.at[0], buf.at[t], sems.at[slot]).wait()
        return c

    lax.fori_loop(0, tm, wait_body, 0, unroll=True)

    start = pl.multiple_of(slot * tm, 8)
    w_rows = buf[pl.ds(start, tm), 0:e].astype(jnp.float32)          # (TM, E)
    us_rows = buf[pl.ds(start, tm), e:e + r].astype(jnp.float32)     # (TM, r)
    delta = jnp.dot(us_rows, v_ref[...], preferred_element_type=jnp.float32)
    out_ref[...] = (w_rows + delta).astype(out_ref.dtype)


# --------------------------------------------------------------------------
# Wrapper
# --------------------------------------------------------------------------
def pissa_embedding_forward(x_ids, w_res, u, s, v, *, tm=256,
                            table_dtype=None, out_dtype=jnp.float32,
                            force_gather=False):
    """x_ids: int32 [...], returns out_dtype [..., E]."""
    N, E = w_res.shape
    r = u.shape[1]
    lead_shape = x_ids.shape
    T = max(1, math.prod(lead_shape))

    if table_dtype is None:
        table_dtype = w_res.dtype
    tbytes = jnp.dtype(table_dtype).itemsize
    obytes = jnp.dtype(out_dtype).itemsize

    # Fold singular values into U once (tiny N x r elementwise op, shared by
    # every tile).  V stays f32 and VMEM-resident.
    us = u.astype(jnp.float32) * s.astype(jnp.float32).reshape(1, r)
    v_f32 = v.astype(jnp.float32)

    # Flatten + clamp ids so row gathers always stay in bounds.
    # TODO(synk): nn.Embedding raises on out-of-range ids; we clamp instead.
    ids = jnp.clip(x_ids.reshape(-1).astype(jnp.int32), 0, N - 1)

    rpad = _round_up(max(r, 1), 128)              # lane-aligned adapter columns
    tm = max(8, min(_round_up(tm, 8), _round_up(T, 8)))

    RESIDENT_BUDGET = 10 << 20                    # fast path only for small tables
    GATHER_BUDGET = 16 << 20                      # safe on v7x's 64 MiB VMEM

    resident_need = ((N * E + N * r) * tbytes + r * E * 4
                     + 2 * tm * E * obytes + tm * N * 4)
    use_resident = (not force_gather) and resident_need <= RESIDENT_BUDGET

    if use_resident:
        t_pad = _round_up(T, tm)
        n_tiles = t_pad // tm
        ids_pad = jnp.pad(ids, (0, t_pad - T)).reshape(n_tiles, tm, 1)
        vmem_limit = int(min(max(2 * resident_need + (2 << 20), 8 << 20), 64 << 20))
        out = pl.pallas_call(
            _resident_kernel,
            out_shape=jax.ShapeDtypeStruct((t_pad, E), out_dtype),
            grid_spec=pltpu.PrefetchScalarGridSpec(
                num_scalar_prefetch=0,
                grid=(n_tiles,),
                in_specs=[
                    pl.BlockSpec((1, tm, 1), lambda i: (i, 0, 0)),  # token ids
                    pl.BlockSpec((N, E), lambda i: (0, 0)),         # W_res resident
                    pl.BlockSpec((N, r), lambda i: (0, 0)),         # U*S resident
                    pl.BlockSpec((r, E), lambda i: (0, 0)),         # V resident
                ],
                out_specs=pl.BlockSpec((tm, E), lambda i: (i, 0)),
            ),
            compiler_params=pltpu.CompilerParams(
                dimension_semantics=("parallel",),
                vmem_limit_bytes=vmem_limit,
            ),
        )(ids_pad, w_res.astype(table_dtype), us.astype(table_dtype), v_f32)
    else:
        # Shrink TM until double-buffered gather scratch + pipelined output
        # blocks fit the budget (caps TM on v7x; v5e/v6e have headroom).
        while tm > 64:
            work = 2 * tm * (E + rpad) * tbytes + 2 * tm * E * obytes
            if work <= GATHER_BUDGET:
                break
            tm = _round_up(max(tm // 2, 64), 8)
        t_pad = _round_up(T, tm)
        n_tiles = t_pad // tm
        ids_pad = jnp.pad(ids, (0, t_pad - T))

        # Fuse [W_res | U*S] rows so ONE DMA per token fetches base + adapter.
        wus = jnp.concatenate(
            [w_res.astype(jnp.float32), jnp.pad(us, ((0, 0), (0, rpad - r)))],
            axis=1).astype(table_dtype)

        gather_need = (2 * tm * (E + rpad) * tbytes + 2 * tm * E * obytes
                       + r * E * 4)
        vmem_limit = int(min(max(2 * gather_need + (2 << 20), 8 << 20), 64 << 20))

        out = pl.pallas_call(
            _gather_kernel,
            out_shape=jax.ShapeDtypeStruct((t_pad, E), out_dtype),
            grid_spec=pltpu.PrefetchScalarGridSpec(
                num_scalar_prefetch=1,                  # token ids -> SMEM
                grid=(n_tiles,),
                in_specs=[
                    pl.BlockSpec(memory_space=pl.ANY),                 # fused table (HBM)
                    pl.BlockSpec((r, E), lambda i, ids_smem: (0, 0)),  # V resident
                ],
                out_specs=pl.BlockSpec((tm, E), lambda i, ids_smem: (i, 0)),
                scratch_shapes=[
                    pltpu.VMEM((2 * tm, E + rpad), table_dtype),  # double-buffered rows
                    pltpu.SemaphoreType.DMA((2,)),                # one sem per slot
                ],
            ),
            compiler_params=pltpu.CompilerParams(
                # Cross-step prefetch carries scratch state -> sequential axis.
                dimension_semantics=("arbitrary",),
                vmem_limit_bytes=vmem_limit,
            ),
        )(ids_pad, wus, v_f32)

    return out[:T].reshape(*lead_shape, E).astype(out_dtype)


if __name__ == "__main__":
    # Small synthetic config consistent with an nn.Embedding base layer.
    B, S = 2, 8          # batch, sequence
    N, E = 64, 128       # num_embeddings, embedding_dim
    r = 8                # PiSSA rank

    key = jax.random.PRNGKey(0)
    k_w, k_x = jax.random.split(key)

    # Base embedding weight, then PiSSA SVD init (init_pissa_weights=True):
    #   U, S, V = top-r SVD(W);  W_res = W - (U * S) @ V
    W = jax.random.normal(k_w, (N, E), dtype=jnp.float32)
    Uf, Sf, Vhf = jnp.linalg.svd(W, full_matrices=False)
    U, Svals, V = Uf[:, :r], Sf[:r], Vhf[:r, :]
    W_res = W - (U * Svals) @ V
    # TODO(synk): pissa_dropout / padding_idx / max_norm are identity at their
    # defaults (p=0.0, None) in this forward path and are omitted.

    x_ids = jax.random.randint(k_x, (B, S), 0, N, dtype=jnp.int32)

    # Pure-JAX reference of the PyTorch forward.
    ref = W_res[x_ids] + (U[x_ids] * Svals) @ V

    # 1) Small-table fast path: tables VMEM-resident, no DMAs.
    out_res = jax.block_until_ready(
        pissa_embedding_forward(x_ids, W_res, U, Svals, V))
    assert out_res.shape == (B, S, E)
    assert jnp.allclose(out_res, ref, atol=2e-2, rtol=2e-2), "resident path mismatch"

    # 2) Large-table path (forced): fused [W_res | U*S] HBM table, per-token row
    #    DMAs double-buffered across grid steps.
    out_g = jax.block_until_ready(
        pissa_embedding_forward(x_ids, W_res, U, Svals, V, force_gather=True))
    assert jnp.allclose(out_g, ref, atol=2e-2, rtol=2e-2), "gather path mismatch"

    # 3) Gather path with bf16 table storage (halves gather bytes); reference
    #    uses identically-rounded bf16 tables so the comparison is consistent.
    W_res_bf = W_res.astype(jnp.bfloat16).astype(jnp.float32)
    US_bf = (U * Svals).astype(jnp.bfloat16).astype(jnp.float32)
    ref_bf = W_res_bf[x_ids] + US_bf[x_ids] @ V
    out_bf = jax.block_until_ready(
        pissa_embedding_forward(x_ids, W_res, U, Svals, V,
                                force_gather=True, table_dtype=jnp.bfloat16))
    assert jnp.allclose(out_bf, ref_bf, atol=2e-2, rtol=2e-2), "bf16 gather mismatch"

    print("KERNEL_OK")
</pallas_src>

<mosaic_0001>
module attributes {stable_mosaic.version = 11 : i64} {
  func.func @_resident_kernel(%arg0: i32, %arg1: memref<1x16x1xi32, #tpu.memory_space<vmem>>, %arg2: memref<64x128xf32, #tpu.memory_space<vmem>>, %arg3: memref<64x8xf32, #tpu.memory_space<vmem>>, %arg4: memref<8x128xf32, #tpu.memory_space<vmem>>, %arg5: memref<16x128xf32, #tpu.memory_space<vmem>>) attributes {dimension_semantics = [#tpu.dimension_semantics<parallel>], iteration_bounds = array<i64: 1>, scalar_prefetch = 0 : i64, scratch_operands = 0 : i64, tpu.core_type = #tpu.core_type<tc>, window_params = [{transform_indices = @transform_0, window_bounds = array<i64: 1, 16, 1>}, {pipeline_mode = #tpu.pipeline_mode<synchronous>, transform_indices = @transform_1, window_bounds = array<i64: 64, 128>}, {pipeline_mode = #tpu.pipeline_mode<synchronous>, transform_indices = @transform_2, window_bounds = array<i64: 64, 8>}, {pipeline_mode = #tpu.pipeline_mode<synchronous>, transform_indices = @transform_3, window_bounds = array<i64: 8, 128>}, {transform_indices = @transform_4, window_bounds = array<i64: 16, 128>}]} {
    %c0 = arith.constant 0 : index
    %c0_0 = arith.constant 0 : index
    %c0_1 = arith.constant 0 : index
    %0 = vector.load %arg1[%c0, %c0_0, %c0_1] : memref<1x16x1xi32, #tpu.memory_space<vmem>>, vector<1x16x1xi32>
    %1 = vector.shape_cast %0 : vector<1x16x1xi32> to vector<16x1xi32>
    %2 = tpu.iota {dimensions = array<i32: 1>} : vector<16x64xi32>
    %3 = vector.broadcast %1 : vector<16x1xi32> to vector<16x64xi32>
    %4 = arith.cmpi eq, %3, %2 : vector<16x64xi32>
    %5 = arith.extui %4 : vector<16x64xi1> to vector<16x64xi32>
    %6 = arith.sitofp %5 : vector<16x64xi32> to vector<16x64xf32>
    %c0_2 = arith.constant 0 : index
    %c0_3 = arith.constant 0 : index
    %7 = vector.load %arg2[%c0_2, %c0_3] : memref<64x128xf32, #tpu.memory_space<vmem>>, vector<64x128xf32>
    %cst = arith.constant dense<0.000000e+00> : vector<16x128xf32>
    %8 = tpu.matmul %6, %7, %cst {dimension_numbers = #tpu.dot_dimension_numbers<[1], [0], [0], [1], [0, 0, 1, 1], [], []>} : vector<16x64xf32>, vector<64x128xf32>, vector<16x128xf32> -> vector<16x128xf32>
    %c0_4 = arith.constant 0 : index
    %c0_5 = arith.constant 0 : index
    %9 = vector.load %arg3[%c0_4, %c0_5] : memref<64x8xf32, #tpu.memory_space<vmem>>, vector<64x8xf32>
    %cst_6 = arith.constant dense<0.000000e+00> : vector<16x8xf32>
    %10 = tpu.matmul %6, %9, %cst_6 {dimension_numbers = #tpu.dot_dimension_numbers<[1], [0], [0], [1], [0, 0, 1, 1], [], []>} : vector<16x64xf32>, vector<64x8xf32>, vector<16x8xf32> -> vector<16x8xf32>
    %c0_7 = arith.constant 0 : index
    %c0_8 = arith.constant 0 : index
    %11 = vector.load %arg4[%c0_7, %c0_8] : memref<8x128xf32, #tpu.memory_space<vmem>>, vector<8x128xf32>
    %cst_9 = arith.constant dense<0.000000e+00> : vector<16x128xf32>
    %12 = tpu.matmul %10, %11, %cst_9 {dimension_numbers = #tpu.dot_dimension_numbers<[1], [0], [0], [1], [0, 0, 1, 1], [], []>} : vector<16x8xf32>, vector<8x128xf32>, vector<16x128xf32> -> vector<16x128xf32>
    %13 = arith.addf %8, %12 : vector<16x128xf32>
    %c0_10 = arith.constant 0 : index
    %c0_11 = arith.constant 0 : index
    %14 = vector.load %arg5[%c0_10, %c0_11] : memref<16x128xf32, #tpu.memory_space<vmem>>, vector<16x128xf32>
    tpu.vector_store %arg5[%c0_10, %c0_11], %13 {strides = array<i32>} : memref<16x128xf32, #tpu.memory_space<vmem>>, vector<16x128xf32>,
    return
  }
  func.func @transform_0(%arg0: i32) -> (i32, i32, i32) {
    %c0_i32 = arith.constant 0 : i32
    %c0_i32_0 = arith.constant 0 : i32
    %c0_i32_1 = arith.constant 0 : i32
    return %arg0, %c0_i32, %c0_i32_0 : i32, i32, i32
  }
  func.func @transform_1(%arg0: i32) -> (i32, i32) {
    %c0_i32 = arith.constant 0 : i32
    %c0_i32_0 = arith.constant 0 : i32
    %c0_i32_1 = arith.constant 0 : i32
    return %c0_i32, %c0_i32_0 : i32, i32
  }
  func.func @transform_2(%arg0: i32) -> (i32, i32) {
    %c0_i32 = arith.constant 0 : i32
    %c0_i32_0 = arith.constant 0 : i32
    %c0_i32_1 = arith.constant 0 : i32
    return %c0_i32, %c0_i32_0 : i32, i32
  }
  func.func @transform_3(%arg0: i32) -> (i32, i32) {
    %c0_i32 = arith.constant 0 : i32
    %c0_i32_0 = arith.constant 0 : i32
    %c0_i32_1 = arith.constant 0 : i32
    return %c0_i32, %c0_i32_0 : i32, i32
  }
  func.func @transform_4(%arg0: i32) -> (i32, i32) {
    %c0_i32 = arith.constant 0 : i32
    %c0_i32_0 = arith.constant 0 : i32
    return %arg0, %c0_i32 : i32, i32
  }
}

</mosaic_0001>

<bundles_post_ra>
// kernel: tpu_custom_call.1
= control target key start
LH: loop header
LB: loop body
LE: loop exit
PB: predicated region body
PF: predicated region fallthrough
CT: control target
= control target key end

     0   :  { %v210_v2 = vmov 0   ;;  %s304_s0 = inlined_call_operand.vmem [shape: s32[1,16,1], index: 0, kind: input, shape index: {}]   ;;  %s305_s1 = inlined_call_operand.vmem [shape: f32[64,128], index: 1, kind: input, shape index: {}]   ;;  %s306_s2 = inlined_call_operand.vmem [shape: f32[64,8], index: 2, kind: input, shape index: {}]   ;;  %s307_s3 = inlined_call_operand.vmem [shape: f32[8,128], index: 3, kind: input, shape index: {}]   ;;  %s308_s4 = inlined_call_operand.hbm [shape: f32[16,128], index: 4, kind: output, shape index: {}]  }
   0x1   :  { %v18_v0 = vld [vmem:[%s304_s0] sm:$0xff]  ;;  %v49_v1 = vld [vmem:[%s306_s2 + $0x38] sm:$0xff]  ;;  %183 = vset.pattern.permute.xlu0 %v210_v2  ;;  %v48_v3 = vld [vmem:[%s306_s2 + $0x30] sm:$0xff] }
   0x2   :  { %65 = vmatpush.msra.mxu0 %v49_v1  ;;  %23 = vperm.xlu0 %183, %v18_v0   ;;  %v47_v4 = vld [vmem:[%s306_s2 + $0x28] sm:$0xff]  ;;  %v41_v5 = vld [vmem:[%s305_s1 + $0x38] sm:$0xff]  ;;  %v40_v6 = vld [vmem:[%s305_s1 + $0x30] sm:$0xff] }
   0x3   :  { %162 = vmatpush.msra.mxu3 %v49_v1  ;;  %170 = vmatpush.msra.mxu2 %v41_v5  ;;  %v46_v7 = vld [vmem:[%s306_s2 + $0x20] sm:$0xff]  ;;  %v39_v8 = vld [vmem:[%s305_s1 + $0x28] sm:$0xff] }
   0x4   :  { %66 = vmatpush.msra.mxu0 %v48_v3 }
   0x5   :  { %163 = vmatpush.msra.mxu3 %v48_v3 }
   0x6   :  { %9 = vsyncpa [#allocation3], 0  ;;  %67 = vmatpush.msra.mxu0 %v47_v4  ;;  %171 = vmatpush.msra.mxu2 %v40_v6  ;;  %v45_v9 = vld [vmem:[%s306_s2 + $0x18] sm:$0xff]  ;;  %v19_v10 = vld [vmem:[%s304_s0 + $0x8] sm:$0xff]  ;;  %v20_v19 = vlaneseq  ;;  %vm50_vm0 = vcmask 523264   ;;  %v211_v22 = vmov 0.0  }
   0x7   :  { %164 = vmatpush.msra.mxu3 %v47_v4  ;;  %v44_v11 = vld [vmem:[%s306_s2 + $0x10] sm:$0xff]  ;;  %v43_v12 = vld [vmem:[%s306_s2 + $0x8] sm:$0xff]  ;;  %v42_v13 = vld [vmem:[%s306_s2] sm:$0xff]  ;;  %vm81_vm3 = vcmask 64512   ;;  %s142_s27 = sshll.u32 %s308_s4, 4  ;;  %s213_s28 = smov 128   ;;  %s143_s27 = int_to_ptr.hbm [resolvable:$true] %s142_s27 }
   0x8   :  { %68 = vmatpush.msra.mxu0 %v46_v7  ;;  %172 = vmatpush.msra.mxu2 %v39_v8  ;;  %v38_v14 = vld [vmem:[%s305_s1 + $0x20] sm:$0xff]  ;;  %v37_v15 = vld [vmem:[%s305_s1 + $0x18] sm:$0xff]  ;;  %v36_v16 = vld [vmem:[%s305_s1 + $0x10] sm:$0xff]  ;;  %v21_v20 = vand.u32 127, %v20_v19  ;;  %s214_s29 = smov 8  }
   0x9   :  { %165 = vmatpush.msra.mxu3 %v46_v7  ;;  %v35_v17 = vld [vmem:[%s305_s1 + $0x8] sm:$0xff]  ;;  %v34_v18 = vld [vmem:[%s305_s1] sm:$0xff]  ;;  %s212_s1 = smov [#allocation2]  }
   0xa   :  { %69 = vmatpush.msra.mxu0 %v45_v9  ;;  %26 = vperm.xlu0 %183, %v19_v10   ;;  %v80_v26 = vld [vmem:[%s307_s3] sm:$0xff]  ;;  %s140_s3 = sshll.u32 %s212_s1, 4  ;;  %s141_s3 = int_to_ptr.vmem [resolvable:$true] %s140_s3 }
   0xb   :  { %166 = vmatpush.msra.mxu3 %v45_v9  ;;  %173 = vmatpush.msra.mxu2 %v38_v14 }
   0xc   :  { %70 = vmatpush.msra.mxu0 %v44_v11  ;;  %103 = vmatpush.msra.mxu1 %v80_v26 }
   0xd   :  { %167 = vmatpush.msra.mxu3 %v44_v11  ;;  %174 = vmatpush.msra.mxu2 %v37_v15 }
   0xe   :  { %71 = vmatpush.msra.mxu0 %v43_v12  ;;  %119 = vmatpush.msrb.mxu1 %v41_v5 }
   0xf   :  { %168 = vmatpush.msra.mxu3 %v43_v12  ;;  %175 = vmatpush.msra.mxu2 %v36_v16 }
  0x10   :  { %72 = vmatpush.msra.mxu0 %v42_v13  ;;  %120 = vmatpush.msrb.mxu1 %v40_v6 }
  0x11   :  { %169 = vmatpush.msra.mxu3 %v42_v13  ;;  %176 = vmatpush.msra.mxu2 %v35_v17 }
  0x12   :  { %121 = vmatpush.msrb.mxu1 %v39_v8 }
  0x13   :  { %177 = vmatpush.msra.mxu2 %v34_v18 }
  0x14   :  { %122 = vmatpush.msrb.mxu1 %v38_v14 }
  0x16   :  { %123 = vmatpush.msrb.mxu1 %v37_v15 }
  0x18   :  { %124 = vmatpush.msrb.mxu1 %v36_v16 }
  0x1a   :  { %125 = vmatpush.msrb.mxu1 %v35_v17 }
  0x1c   :  { %126 = vmatpush.msrb.mxu1 %v34_v18 }
  0x74   :  { %v24_v21 = vpop.permute.xlu0 %23 }
  0x75   :  { %vm28_vm1 = vcmp.eq.s32.totalorder %v24_v21, %v21_v20 }
  0x76   :  { %v154_v23 = vsel %vm28_vm1, 1.0, %v211_v22 }
  0x77   :  { %156 = vmatmul.msk.f32.vlgmr.msra.gmra.mxu0 %vm50_vm0, %v154_v23 }
  0x7c   :  { %v27_v24 = vpop.permute.xlu0 %26 }
  0x7d   :  { %vm29_vm2 = vcmp.eq.s32.totalorder %v27_v24, %v21_v20 }
  0x7e   :  { %v155_v25 = vsel %vm29_vm2, 1.0, %v211_v22 }
  0x7f   :  { %157 = vmatmul.msk.f32.vlgmr.msra.gmra.mxu3 %vm50_vm0, %v155_v25  ;;  %161 = vmatmul.msk.f32.vlgmr.msra.gmra.mxu2 %vm50_vm0, %v155_v25 }
  0xf4   :  { %v74_v27 = vpop.f32.mrf.mxu0 }
  0xf5   :  { %158 = vmatmul.msk.f32.vlgmr.msra.gmra.mxu1 %vm81_vm3, %v74_v27 }
 0x102   :  { %v77_v28 = vpop.f32.mrf.mxu3  ;;  %v131_v30 = vpop.f32.mrf.mxu2 }
 0x103   :  { %159 = vmatmul.msk.f32.gmra.mxu1 %vm81_vm3, %v77_v28 }
 0x10b   :  { %160 = vmatmul.msk.f32.vlgmr.msrb.gmra.mxu1 %vm50_vm0, %v154_v23 }
 0x172   :  { %v105_v29 = vpop.f32.mrf.mxu1 }
 0x180   :  { %v108_v31 = vpop.f32.mrf.mxu1 }
 0x181   :  { %v132_v32 = vadd.f32 %v131_v30, %v108_v31 }
 0x183   :  { %135 = vst [vmem:[#allocation2 + $0x8] sm:$0xff] %v132_v32 }
 0x188   :  { %v128_v33 = vpop.f32.mrf.mxu1 }
 0x189   :  { %v129_v34 = vadd.f32 %v128_v33, %v105_v29 }
 0x18b   :  { %134 = vst [vmem:[#allocation2] sm:$0xff] %v129_v34 }
 0x18c   :  { %148 = dma.vmem_to_hbm [thread:$0]  %s141_s3, 256, %s143_s27, [#allocation3], %s213_s28, %s213_s28, %s214_s29  }
 0x18d   :  { %208 = dma.done.wait [#allocation3], 256  }
 0x18e   :  { %209 = vsyncadd [#allocation3], 4294967040 }
 0x18f   :  { %153 = vsyncpa [#allocation3], 1 }

</bundles_post_ra>
